<compile_context>
chip_gen: v5e
topology: v5e:2x2
jax: 0.10.0
libtpu: 0.0.40
codegen_flags: <defaults>
</compile_context>

<pallas_src>
import functools

import jax
import jax.numpy as jnp
from jax.experimental import pallas as pl
from jax.experimental.pallas import tpu as pltpu

_LANE = 128
_SUBLANE = 8


def _round_up(x, m):
    return (x + m - 1) // m * m


def _choose_tile_n(n, s, d_store, out_dim, tile_n_max=512,
                   vmem_budget=24 * 1024 * 1024):
    """Largest row tile keeping the double-buffered f32 working set under a
    conservative VMEM budget (sized so it also fits v7x's 64 MiB VMEM)."""
    bytes_per_row = 4 * ((s + 1) * d_store + out_dim)
    cap = max(_SUBLANE,
              (vmem_budget // (2 * bytes_per_row)) // _SUBLANE * _SUBLANE)
    return int(min(tile_n_max, cap, _round_up(n, _SUBLANE)))


# -----------------------------------------------------------------------------
# Pallas kernels
# -----------------------------------------------------------------------------
def _neighbor_sum(neigh_ref):
    # [S, tn, D] -> [tn, D]: S-1 lane-dense VPU adds (no cross-sublane reduce).
    s_total = neigh_ref.shape[0]
    acc = neigh_ref[0]
    for s in range(1, s_total):
        acc = acc + neigh_ref[s]
    return acc


def _sage_concat_kernel(x_ref, neigh_ref, ws_ref, wn_ref, out_ref,
                        *, h_pad, apply_relu):
    x = x_ref[...]                                   # [tn, Ds] f32
    nsum = _neighbor_sum(neigh_ref)                  # [tn, Ds] f32
    h_self = jnp.dot(x.astype(jnp.bfloat16), ws_ref[...],
                     preferred_element_type=jnp.float32)     # [tn, Hp]
    h_neigh = jnp.dot(nsum.astype(jnp.bfloat16), wn_ref[...],
                      preferred_element_type=jnp.float32)    # [tn, Hp]
    if apply_relu:
        h_self = jnp.maximum(h_self, 0.0)
        h_neigh = jnp.maximum(h_neigh, 0.0)
    # Write the halves directly; both slices are 128-lane aligned, so no
    # result concatenate/relayout and no masked stores.
    out_ref[:, :h_pad] = h_self.astype(out_ref.dtype)
    out_ref[:, h_pad:] = h_neigh.astype(out_ref.dtype)


def _sage_add_kernel(x_ref, neigh_ref, w_ref, out_ref, *, apply_relu):
    x = x_ref[...]                                   # [tn, Ds] f32
    nsum = _neighbor_sum(neigh_ref)                  # [tn, Ds] f32
    # Fused matmul: [x | nsum] @ [w_self ; w_neigh]  (single MXU contraction).
    xin = jnp.concatenate([x, nsum], axis=-1).astype(jnp.bfloat16)  # [tn, 2Ds]
    out = jnp.dot(xin, w_ref[...], preferred_element_type=jnp.float32)
    if apply_relu:
        out = jnp.maximum(out, 0.0)
    out_ref[...] = out.astype(out_ref.dtype)


# -----------------------------------------------------------------------------
# One SAGEAggregator hop
# -----------------------------------------------------------------------------
def sage_aggregate(x_self, x_neigh, w_self, w_neigh, *, concat, apply_relu,
                   h_pad, tile_n_max=512):
    """One SAGEAggregator hop.

    x_self:  [N, Ds]     f32 activations in the padded store layout
    x_neigh: [S, N, Ds]  f32 neighbor activations, hop-major layout
    w_self:  [Ds, Hp]    bf16, output columns zero-padded to Hp (mult of 128)
    w_neigh: [Ds, Hp]    bf16, same, with the mean aggregator's 1/S folded in
    returns: [N, 2*Hp] (concat) or [N, Hp], f32
    """
    n, d_store = x_self.shape
    s = x_neigh.shape[0]
    out_dim = 2 * h_pad if concat else h_pad

    tile_n = _choose_tile_n(n, s, d_store, out_dim, tile_n_max)
    n_pad = _round_up(n, tile_n)
    if n_pad != n:
        x_self = jnp.pad(x_self, ((0, n_pad - n), (0, 0)))
        x_neigh = jnp.pad(x_neigh, ((0, 0), (0, n_pad - n), (0, 0)))

    x_spec = pl.BlockSpec((tile_n, d_store), lambda i: (i, 0))
    neigh_spec = pl.BlockSpec((s, tile_n, d_store), lambda i: (0, i, 0))
    w_spec = pl.BlockSpec((d_store, h_pad), lambda i: (0, 0))

    if concat:
        kernel = functools.partial(_sage_concat_kernel, h_pad=h_pad,
                                   apply_relu=apply_relu)
        in_specs = [x_spec, neigh_spec, w_spec, w_spec]
        args = (x_self, x_neigh, w_self, w_neigh)
    else:
        w_cat = jnp.concatenate([w_self, w_neigh], axis=0)      # [2*Ds, Hp]
        kernel = functools.partial(_sage_add_kernel, apply_relu=apply_relu)
        in_specs = [x_spec, neigh_spec,
                    pl.BlockSpec((2 * d_store, h_pad), lambda i: (0, 0))]
        args = (x_self, x_neigh, w_cat)

    out = pl.pallas_call(
        kernel,
        out_shape=jax.ShapeDtypeStruct((n_pad, out_dim), jnp.float32),
        grid_spec=pltpu.PrefetchScalarGridSpec(
            num_scalar_prefetch=0,
            grid=(n_pad // tile_n,),
            in_specs=in_specs,
            out_specs=pl.BlockSpec((tile_n, out_dim), lambda i: (i, 0)),
        ),
        compiler_params=pltpu.CompilerParams(
            dimension_semantics=("parallel",)),
    )(*args)

    return out[:n] if n_pad != n else out


# -----------------------------------------------------------------------------
# Layered forward (mirrors the PyTorch module loop structure)
# -----------------------------------------------------------------------------
def _expand_weight(w, segments, d_store, h_pad):
    """Scatter logical weight rows into the padded activation layout and
    zero-pad output columns to h_pad (lane-dense). Returns f32."""
    d_logical, h = w.shape
    out = jnp.zeros((d_store, h_pad), jnp.float32)
    row = 0
    for off, ln in segments:
        out = out.at[off:off + ln, :h].set(w[row:row + ln, :])
        row += ln
    assert row == d_logical, (row, d_logical)
    return out


def graphsage_forward(x, nodes, neighbors, weights, *, concats, sizes,
                      output_normalize=False):
    # Gather features (plain JAX glue).
    h = [jnp.take(x, idx, axis=0) for idx in (nodes, *neighbors)]

    # Store-layout bookkeeping: segments of real columns inside padded dims.
    segments = ((0, x.shape[-1]),)
    d_store = x.shape[-1]

    for i, (w_s, w_n) in enumerate(weights):
        layer_concat = concats[i]
        hidden = w_s.shape[1]
        h_pad = _round_up(hidden, _LANE)
        apply_relu = (i != len(sizes) - 1)

        ws_p = _expand_weight(w_s, segments, d_store, h_pad)
        wn_p = _expand_weight(w_n, segments, d_store, h_pad)
        ws_bf = ws_p.astype(jnp.bfloat16)

        for j in range(len(sizes) - i):
            n_j = h[j].shape[0]
            s_j = sizes[j]
            # Hop-major neighbor layout -> pure-VPU in-kernel sum.
            neigh = jnp.transpose(h[j + 1].reshape(n_j, s_j, d_store),
                                  (1, 0, 2))
            # mean -> sum: fold 1/S into the neighbor weight (per hop).
            wn_bf = (wn_p * (1.0 / s_j)).astype(jnp.bfloat16)
            h[j] = sage_aggregate(h[j], neigh, ws_bf, wn_bf,
                                  concat=layer_concat,
                                  apply_relu=apply_relu,
                                  h_pad=h_pad)
            # dropout: identity at inference time
        h.pop()

        if layer_concat:
            segments = ((0, hidden), (h_pad, hidden))
            d_store = 2 * h_pad
        else:
            segments = ((0, hidden),)
            d_store = h_pad

    out = h[0]
    # Strip the lane padding once, at the very end.
    parts = [out[:, off:off + ln] for off, ln in segments]
    out = parts[0] if len(parts) == 1 else jnp.concatenate(parts, axis=-1)
    if output_normalize:
        out = out / jnp.maximum(
            jnp.linalg.norm(out, axis=1, keepdims=True), 1e-12)
    return out


# Pure-JAX f32 reference for the correctness check.
def graphsage_reference(x, nodes, neighbors, weights, concats, sizes):
    h = [jnp.take(x, idx, axis=0) for idx in (nodes, *neighbors)]
    for i, (w_s, w_n) in enumerate(weights):
        dim = h[0].shape[-1]
        for j in range(len(sizes) - i):
            neigh = jnp.mean(h[j + 1].reshape(-1, sizes[j], dim), axis=1)
            out = (jnp.concatenate([h[j] @ w_s, neigh @ w_n], axis=-1)
                   if concats[i] else h[j] @ w_s + neigh @ w_n)
            if i != len(sizes) - 1:
                out = jnp.maximum(out, 0.0)
            h[j] = out
        h.pop()
    return h[0]


if __name__ == "__main__":
    key = jax.random.PRNGKey(0)

    # Module hyper-parameters (defaults of GraphSAGE).
    in_features = 16
    hids = [32]
    out_features = 8
    sizes = (15, 5)
    concat = True           # hidden aggregators; final aggregator adds
    num_nodes = 256
    batch = 8

    k_x, k_n0, k_n1, k_n2, k_w0a, k_w0b, k_w1a, k_w1b = jax.random.split(key, 8)

    x = jax.random.normal(k_x, (num_nodes, in_features), dtype=jnp.float32)
    nodes = jax.random.randint(k_n0, (batch,), 0, num_nodes)
    neigh1 = jax.random.randint(k_n1, (batch * sizes[0],), 0, num_nodes)
    neigh2 = jax.random.randint(k_n2, (batch * sizes[0] * sizes[1],),
                                0, num_nodes)

    def init_w(k, shape):
        fan_in = shape[0]
        return (jax.random.uniform(k, shape, jnp.float32, -1.0, 1.0)
                / jnp.sqrt(fan_in))

    l1_in = 2 * hids[0] if concat else hids[0]
    weights = (
        (init_w(k_w0a, (in_features, hids[0])),
         init_w(k_w0b, (in_features, hids[0]))),
        (init_w(k_w1a, (l1_in, out_features)),
         init_w(k_w1b, (l1_in, out_features))),
    )
    concats = (concat, False)   # last SAGEAggregator uses its default concat=False

    fwd = jax.jit(graphsage_forward,
                  static_argnames=("concats", "sizes", "output_normalize"))
    out = fwd(x, nodes, (neigh1, neigh2), weights,
              concats=concats, sizes=sizes)
    out = jax.block_until_ready(out)

    ref = graphsage_reference(x, nodes, (neigh1, neigh2), weights,
                              concats, sizes)
    assert out.shape == (batch, out_features), out.shape
    max_err = float(jnp.max(jnp.abs(out - ref)))
    # Kernel matmuls run in bf16 on the MXU (f32 accumulation) vs f32 reference.
    assert jnp.allclose(out, ref, rtol=5e-2, atol=5e-2), max_err

    print("KERNEL_OK")
</pallas_src>

<mosaic_0001>
module attributes {stable_mosaic.version = 11 : i64} {
  func.func @_sage_concat_kernel(%arg0: i32, %arg1: memref<8x16xf32, #tpu.memory_space<vmem>>, %arg2: memref<15x8x16xf32, #tpu.memory_space<vmem>>, %arg3: memref<16x128xbf16, #tpu.memory_space<vmem>>, %arg4: memref<16x128xbf16, #tpu.memory_space<vmem>>, %arg5: memref<8x256xf32, #tpu.memory_space<vmem>>) attributes {dimension_semantics = [#tpu.dimension_semantics<parallel>], iteration_bounds = array<i64: 1>, scalar_prefetch = 0 : i64, scratch_operands = 0 : i64, tpu.core_type = #tpu.core_type<tc>, window_params = [{transform_indices = @transform_0, window_bounds = array<i64: 8, 16>}, {transform_indices = @transform_1, window_bounds = array<i64: 15, 8, 16>}, {pipeline_mode = #tpu.pipeline_mode<synchronous>, transform_indices = @transform_2, window_bounds = array<i64: 16, 128>}, {pipeline_mode = #tpu.pipeline_mode<synchronous>, transform_indices = @transform_3, window_bounds = array<i64: 16, 128>}, {transform_indices = @transform_4, window_bounds = array<i64: 8, 256>}]} {
    %c0 = arith.constant 0 : index
    %c0_0 = arith.constant 0 : index
    %0 = vector.load %arg1[%c0, %c0_0] : memref<8x16xf32, #tpu.memory_space<vmem>>, vector<8x16xf32>
    %c0_1 = arith.constant 0 : index
    %c0_2 = arith.constant 0 : index
    %c0_3 = arith.constant 0 : index
    %1 = vector.load %arg2[%c0_1, %c0_2, %c0_3] : memref<15x8x16xf32, #tpu.memory_space<vmem>>, vector<1x8x16xf32>
    %2 = vector.shape_cast %1 : vector<1x8x16xf32> to vector<8x16xf32>
    %c1 = arith.constant 1 : index
    %c0_4 = arith.constant 0 : index
    %c0_5 = arith.constant 0 : index
    %3 = vector.load %arg2[%c1, %c0_4, %c0_5] : memref<15x8x16xf32, #tpu.memory_space<vmem>>, vector<1x8x16xf32>
    %4 = vector.shape_cast %3 : vector<1x8x16xf32> to vector<8x16xf32>
    %5 = arith.addf %2, %4 : vector<8x16xf32>
    %c2 = arith.constant 2 : index
    %c0_6 = arith.constant 0 : index
    %c0_7 = arith.constant 0 : index
    %6 = vector.load %arg2[%c2, %c0_6, %c0_7] : memref<15x8x16xf32, #tpu.memory_space<vmem>>, vector<1x8x16xf32>
    %7 = vector.shape_cast %6 : vector<1x8x16xf32> to vector<8x16xf32>
    %8 = arith.addf %5, %7 : vector<8x16xf32>
    %c3 = arith.constant 3 : index
    %c0_8 = arith.constant 0 : index
    %c0_9 = arith.constant 0 : index
    %9 = vector.load %arg2[%c3, %c0_8, %c0_9] : memref<15x8x16xf32, #tpu.memory_space<vmem>>, vector<1x8x16xf32>
    %10 = vector.shape_cast %9 : vector<1x8x16xf32> to vector<8x16xf32>
    %11 = arith.addf %8, %10 : vector<8x16xf32>
    %c4 = arith.constant 4 : index
    %c0_10 = arith.constant 0 : index
    %c0_11 = arith.constant 0 : index
    %12 = vector.load %arg2[%c4, %c0_10, %c0_11] : memref<15x8x16xf32, #tpu.memory_space<vmem>>, vector<1x8x16xf32>
    %13 = vector.shape_cast %12 : vector<1x8x16xf32> to vector<8x16xf32>
    %14 = arith.addf %11, %13 : vector<8x16xf32>
    %c5 = arith.constant 5 : index
    %c0_12 = arith.constant 0 : index
    %c0_13 = arith.constant 0 : index
    %15 = vector.load %arg2[%c5, %c0_12, %c0_13] : memref<15x8x16xf32, #tpu.memory_space<vmem>>, vector<1x8x16xf32>
    %16 = vector.shape_cast %15 : vector<1x8x16xf32> to vector<8x16xf32>
    %17 = arith.addf %14, %16 : vector<8x16xf32>
    %c6 = arith.constant 6 : index
    %c0_14 = arith.constant 0 : index
    %c0_15 = arith.constant 0 : index
    %18 = vector.load %arg2[%c6, %c0_14, %c0_15] : memref<15x8x16xf32, #tpu.memory_space<vmem>>, vector<1x8x16xf32>
    %19 = vector.shape_cast %18 : vector<1x8x16xf32> to vector<8x16xf32>
    %20 = arith.addf %17, %19 : vector<8x16xf32>
    %c7 = arith.constant 7 : index
    %c0_16 = arith.constant 0 : index
    %c0_17 = arith.constant 0 : index
    %21 = vector.load %arg2[%c7, %c0_16, %c0_17] : memref<15x8x16xf32, #tpu.memory_space<vmem>>, vector<1x8x16xf32>
    %22 = vector.shape_cast %21 : vector<1x8x16xf32> to vector<8x16xf32>
    %23 = arith.addf %20, %22 : vector<8x16xf32>
    %c8 = arith.constant 8 : index
    %c0_18 = arith.constant 0 : index
    %c0_19 = arith.constant 0 : index
    %24 = vector.load %arg2[%c8, %c0_18, %c0_19] : memref<15x8x16xf32, #tpu.memory_space<vmem>>, vector<1x8x16xf32>
    %25 = vector.shape_cast %24 : vector<1x8x16xf32> to vector<8x16xf32>
    %26 = arith.addf %23, %25 : vector<8x16xf32>
    %c9 = arith.constant 9 : index
    %c0_20 = arith.constant 0 : index
    %c0_21 = arith.constant 0 : index
    %27 = vector.load %arg2[%c9, %c0_20, %c0_21] : memref<15x8x16xf32, #tpu.memory_space<vmem>>, vector<1x8x16xf32>
    %28 = vector.shape_cast %27 : vector<1x8x16xf32> to vector<8x16xf32>
    %29 = arith.addf %26, %28 : vector<8x16xf32>
    %c10 = arith.constant 10 : index
    %c0_22 = arith.constant 0 : index
    %c0_23 = arith.constant 0 : index
    %30 = vector.load %arg2[%c10, %c0_22, %c0_23] : memref<15x8x16xf32, #tpu.memory_space<vmem>>, vector<1x8x16xf32>
    %31 = vector.shape_cast %30 : vector<1x8x16xf32> to vector<8x16xf32>
    %32 = arith.addf %29, %31 : vector<8x16xf32>
    %c11 = arith.constant 11 : index
    %c0_24 = arith.constant 0 : index
    %c0_25 = arith.constant 0 : index
    %33 = vector.load %arg2[%c11, %c0_24, %c0_25] : memref<15x8x16xf32, #tpu.memory_space<vmem>>, vector<1x8x16xf32>
    %34 = vector.shape_cast %33 : vector<1x8x16xf32> to vector<8x16xf32>
    %35 = arith.addf %32, %34 : vector<8x16xf32>
    %c12 = arith.constant 12 : index
    %c0_26 = arith.constant 0 : index
    %c0_27 = arith.constant 0 : index
    %36 = vector.load %arg2[%c12, %c0_26, %c0_27] : memref<15x8x16xf32, #tpu.memory_space<vmem>>, vector<1x8x16xf32>
    %37 = vector.shape_cast %36 : vector<1x8x16xf32> to vector<8x16xf32>
    %38 = arith.addf %35, %37 : vector<8x16xf32>
    %c13 = arith.constant 13 : index
    %c0_28 = arith.constant 0 : index
    %c0_29 = arith.constant 0 : index
    %39 = vector.load %arg2[%c13, %c0_28, %c0_29] : memref<15x8x16xf32, #tpu.memory_space<vmem>>, vector<1x8x16xf32>
    %40 = vector.shape_cast %39 : vector<1x8x16xf32> to vector<8x16xf32>
    %41 = arith.addf %38, %40 : vector<8x16xf32>
    %c14 = arith.constant 14 : index
    %c0_30 = arith.constant 0 : index
    %c0_31 = arith.constant 0 : index
    %42 = vector.load %arg2[%c14, %c0_30, %c0_31] : memref<15x8x16xf32, #tpu.memory_space<vmem>>, vector<1x8x16xf32>
    %43 = vector.shape_cast %42 : vector<1x8x16xf32> to vector<8x16xf32>
    %44 = arith.addf %41, %43 : vector<8x16xf32>
    %45 = arith.truncf %0 : vector<8x16xf32> to vector<8x16xbf16>
    %c0_32 = arith.constant 0 : index
    %c0_33 = arith.constant 0 : index
    %46 = vector.load %arg3[%c0_32, %c0_33] : memref<16x128xbf16, #tpu.memory_space<vmem>>, vector<16x128xbf16>
    %cst = arith.constant dense<0.000000e+00> : vector<8x128xf32>
    %47 = tpu.matmul %45, %46, %cst {dimension_numbers = #tpu.dot_dimension_numbers<[1], [0], [0], [1], [0, 0, 1, 1], [], []>} : vector<8x16xbf16>, vector<16x128xbf16>, vector<8x128xf32> -> vector<8x128xf32>
    %48 = arith.truncf %44 : vector<8x16xf32> to vector<8x16xbf16>
    %c0_34 = arith.constant 0 : index
    %c0_35 = arith.constant 0 : index
    %49 = vector.load %arg4[%c0_34, %c0_35] : memref<16x128xbf16, #tpu.memory_space<vmem>>, vector<16x128xbf16>
    %cst_36 = arith.constant dense<0.000000e+00> : vector<8x128xf32>
    %50 = tpu.matmul %48, %49, %cst_36 {dimension_numbers = #tpu.dot_dimension_numbers<[1], [0], [0], [1], [0, 0, 1, 1], [], []>} : vector<8x16xbf16>, vector<16x128xbf16>, vector<8x128xf32> -> vector<8x128xf32>
    %cst_37 = arith.constant 0.000000e+00 : f32
    %51 = vector.broadcast %cst_37 : f32 to vector<8x128xf32>
    %52 = arith.maximumf %47, %51 : vector<8x128xf32>
    %cst_38 = arith.constant 0.000000e+00 : f32
    %53 = vector.broadcast %cst_38 : f32 to vector<8x128xf32>
    %54 = arith.maximumf %50, %53 : vector<8x128xf32>
    %c0_39 = arith.constant 0 : index
    %c0_40 = arith.constant 0 : index
    %55 = vector.load %arg5[%c0_39, %c0_40] : memref<8x256xf32, #tpu.memory_space<vmem>>, vector<8x128xf32>
    tpu.vector_store %arg5[%c0_39, %c0_40], %52 {strides = array<i32>} : memref<8x256xf32, #tpu.memory_space<vmem>>, vector<8x128xf32>,
    %c0_41 = arith.constant 0 : index
    %c128 = arith.constant 128 : index
    %56 = vector.load %arg5[%c0_41, %c128] : memref<8x256xf32, #tpu.memory_space<vmem>>, vector<8x128xf32>
    tpu.vector_store %arg5[%c0_41, %c128], %54 {strides = array<i32>} : memref<8x256xf32, #tpu.memory_space<vmem>>, vector<8x128xf32>,
    return
  }
  func.func @transform_0(%arg0: i32) -> (i32, i32) {
    %c0_i32 = arith.constant 0 : i32
    %c0_i32_0 = arith.constant 0 : i32
    return %arg0, %c0_i32 : i32, i32
  }
  func.func @transform_1(%arg0: i32) -> (i32, i32, i32) {
    %c0_i32 = arith.constant 0 : i32
    %c0_i32_0 = arith.constant 0 : i32
    %c0_i32_1 = arith.constant 0 : i32
    return %c0_i32, %arg0, %c0_i32_0 : i32, i32, i32
  }
  func.func @transform_2(%arg0: i32) -> (i32, i32) {
    %c0_i32 = arith.constant 0 : i32
    %c0_i32_0 = arith.constant 0 : i32
    %c0_i32_1 = arith.constant 0 : i32
    return %c0_i32, %c0_i32_0 : i32, i32
  }
  func.func @transform_3(%arg0: i32) -> (i32, i32) {
    %c0_i32 = arith.constant 0 : i32
    %c0_i32_0 = arith.constant 0 : i32
    %c0_i32_1 = arith.constant 0 : i32
    return %c0_i32, %c0_i32_0 : i32, i32
  }
  func.func @transform_4(%arg0: i32) -> (i32, i32) {
    %c0_i32 = arith.constant 0 : i32
    %c0_i32_0 = arith.constant 0 : i32
    return %arg0, %c0_i32 : i32, i32
  }
}

module attributes {stable_mosaic.version = 11 : i64} {
  func.func @_sage_concat_kernel(%arg0: i32, %arg1: memref<120x16xf32, #tpu.memory_space<vmem>>, %arg2: memref<5x120x16xf32, #tpu.memory_space<vmem>>, %arg3: memref<16x128xbf16, #tpu.memory_space<vmem>>, %arg4: memref<16x128xbf16, #tpu.memory_space<vmem>>, %arg5: memref<120x256xf32, #tpu.memory_space<vmem>>) attributes {dimension_semantics = [#tpu.dimension_semantics<parallel>], iteration_bounds = array<i64: 1>, scalar_prefetch = 0 : i64, scratch_operands = 0 : i64, tpu.core_type = #tpu.core_type<tc>, window_params = [{transform_indices = @transform_0, window_bounds = array<i64: 120, 16>}, {transform_indices = @transform_1, window_bounds = array<i64: 5, 120, 16>}, {pipeline_mode = #tpu.pipeline_mode<synchronous>, transform_indices = @transform_2, window_bounds = array<i64: 16, 128>}, {pipeline_mode = #tpu.pipeline_mode<synchronous>, transform_indices = @transform_3, window_bounds = array<i64: 16, 128>}, {transform_indices = @transform_4, window_bounds = array<i64: 120, 256>}]} {
    %c0 = arith.constant 0 : index
    %c0_0 = arith.constant 0 : index
    %0 = vector.load %arg1[%c0, %c0_0] : memref<120x16xf32, #tpu.memory_space<vmem>>, vector<120x16xf32>
    %c0_1 = arith.constant 0 : index
    %c0_2 = arith.constant 0 : index
    %c0_3 = arith.constant 0 : index
    %1 = vector.load %arg2[%c0_1, %c0_2, %c0_3] : memref<5x120x16xf32, #tpu.memory_space<vmem>>, vector<1x120x16xf32>
    %2 = vector.shape_cast %1 : vector<1x120x16xf32> to vector<120x16xf32>
    %c1 = arith.constant 1 : index
    %c0_4 = arith.constant 0 : index
    %c0_5 = arith.constant 0 : index
    %3 = vector.load %arg2[%c1, %c0_4, %c0_5] : memref<5x120x16xf32, #tpu.memory_space<vmem>>, vector<1x120x16xf32>
    %4 = vector.shape_cast %3 : vector<1x120x16xf32> to vector<120x16xf32>
    %5 = arith.addf %2, %4 : vector<120x16xf32>
    %c2 = arith.constant 2 : index
    %c0_6 = arith.constant 0 : index
    %c0_7 = arith.constant 0 : index
    %6 = vector.load %arg2[%c2, %c0_6, %c0_7] : memref<5x120x16xf32, #tpu.memory_space<vmem>>, vector<1x120x16xf32>
    %7 = vector.shape_cast %6 : vector<1x120x16xf32> to vector<120x16xf32>
    %8 = arith.addf %5, %7 : vector<120x16xf32>
    %c3 = arith.constant 3 : index
    %c0_8 = arith.constant 0 : index
    %c0_9 = arith.constant 0 : index
    %9 = vector.load %arg2[%c3, %c0_8, %c0_9] : memref<5x120x16xf32, #tpu.memory_space<vmem>>, vector<1x120x16xf32>
    %10 = vector.shape_cast %9 : vector<1x120x16xf32> to vector<120x16xf32>
    %11 = arith.addf %8, %10 : vector<120x16xf32>
    %c4 = arith.constant 4 : index
    %c0_10 = arith.constant 0 : index
    %c0_11 = arith.constant 0 : index
    %12 = vector.load %arg2[%c4, %c0_10, %c0_11] : memref<5x120x16xf32, #tpu.memory_space<vmem>>, vector<1x120x16xf32>
    %13 = vector.shape_cast %12 : vector<1x120x16xf32> to vector<120x16xf32>
    %14 = arith.addf %11, %13 : vector<120x16xf32>
    %15 = arith.truncf %0 : vector<120x16xf32> to vector<120x16xbf16>
    %c0_12 = arith.constant 0 : index
    %c0_13 = arith.constant 0 : index
    %16 = vector.load %arg3[%c0_12, %c0_13] : memref<16x128xbf16, #tpu.memory_space<vmem>>, vector<16x128xbf16>
    %cst = arith.constant dense<0.000000e+00> : vector<120x128xf32>
    %17 = tpu.matmul %15, %16, %cst {dimension_numbers = #tpu.dot_dimension_numbers<[1], [0], [0], [1], [0, 0, 1, 1], [], []>} : vector<120x16xbf16>, vector<16x128xbf16>, vector<120x128xf32> -> vector<120x128xf32>
    %18 = arith.truncf %14 : vector<120x16xf32> to vector<120x16xbf16>
    %c0_14 = arith.constant 0 : index
    %c0_15 = arith.constant 0 : index
    %19 = vector.load %arg4[%c0_14, %c0_15] : memref<16x128xbf16, #tpu.memory_space<vmem>>, vector<16x128xbf16>
    %cst_16 = arith.constant dense<0.000000e+00> : vector<120x128xf32>
    %20 = tpu.matmul %18, %19, %cst_16 {dimension_numbers = #tpu.dot_dimension_numbers<[1], [0], [0], [1], [0, 0, 1, 1], [], []>} : vector<120x16xbf16>, vector<16x128xbf16>, vector<120x128xf32> -> vector<120x128xf32>
    %cst_17 = arith.constant 0.000000e+00 : f32
    %21 = vector.broadcast %cst_17 : f32 to vector<120x128xf32>
    %22 = arith.maximumf %17, %21 : vector<120x128xf32>
    %cst_18 = arith.constant 0.000000e+00 : f32
    %23 = vector.broadcast %cst_18 : f32 to vector<120x128xf32>
    %24 = arith.maximumf %20, %23 : vector<120x128xf32>
    %c0_19 = arith.constant 0 : index
    %c0_20 = arith.constant 0 : index
    %25 = vector.load %arg5[%c0_19, %c0_20] : memref<120x256xf32, #tpu.memory_space<vmem>>, vector<120x128xf32>
    tpu.vector_store %arg5[%c0_19, %c0_20], %22 {strides = array<i32>} : memref<120x256xf32, #tpu.memory_space<vmem>>, vector<120x128xf32>,
    %c0_21 = arith.constant 0 : index
    %c128 = arith.constant 128 : index
    %26 = vector.load %arg5[%c0_21, %c128] : memref<120x256xf32, #tpu.memory_space<vmem>>, vector<120x128xf32>
    tpu.vector_store %arg5[%c0_21, %c128], %24 {strides = array<i32>} : memref<120x256xf32, #tpu.memory_space<vmem>>, vector<120x128xf32>,
    return
  }
  func.func @transform_0(%arg0: i32) -> (i32, i32) {
    %c0_i32 = arith.constant 0 : i32
    %c0_i32_0 = arith.constant 0 : i32
    return %arg0, %c0_i32 : i32, i32
  }
  func.func @transform_1(%arg0: i32) -> (i32, i32, i32) {
    %c0_i32 = arith.constant 0 : i32
    %c0_i32_0 = arith.constant 0 : i32
    %c0_i32_1 = arith.constant 0 : i32
    return %c0_i32, %arg0, %c0_i32_0 : i32, i32, i32
  }
  func.func @transform_2(%arg0: i32) -> (i32, i32) {
    %c0_i32 = arith.constant 0 : i32
    %c0_i32_0 = arith.constant 0 : i32
    %c0_i32_1 = arith.constant 0 : i32
    return %c0_i32, %c0_i32_0 : i32, i32
  }
  func.func @transform_3(%arg0: i32) -> (i32, i32) {
    %c0_i32 = arith.constant 0 : i32
    %c0_i32_0 = arith.constant 0 : i32
    %c0_i32_1 = arith.constant 0 : i32
    return %c0_i32, %c0_i32_0 : i32, i32
  }
  func.func @transform_4(%arg0: i32) -> (i32, i32) {
    %c0_i32 = arith.constant 0 : i32
    %c0_i32_0 = arith.constant 0 : i32
    return %arg0, %c0_i32 : i32, i32
  }
}

module attributes {stable_mosaic.version = 11 : i64} {
  func.func @_sage_add_kernel(%arg0: i32, %arg1: memref<8x256xf32, #tpu.memory_space<vmem>>, %arg2: memref<15x8x256xf32, #tpu.memory_space<vmem>>, %arg3: memref<512x128xbf16, #tpu.memory_space<vmem>>, %arg4: memref<8x128xf32, #tpu.memory_space<vmem>>) attributes {dimension_semantics = [#tpu.dimension_semantics<parallel>], iteration_bounds = array<i64: 1>, scalar_prefetch = 0 : i64, scratch_operands = 0 : i64, tpu.core_type = #tpu.core_type<tc>, window_params = [{transform_indices = @transform_0, window_bounds = array<i64: 8, 256>}, {transform_indices = @transform_1, window_bounds = array<i64: 15, 8, 256>}, {pipeline_mode = #tpu.pipeline_mode<synchronous>, transform_indices = @transform_2, window_bounds = array<i64: 512, 128>}, {transform_indices = @transform_3, window_bounds = array<i64: 8, 128>}]} {
    %c0 = arith.constant 0 : index
    %c0_0 = arith.constant 0 : index
    %0 = vector.load %arg1[%c0, %c0_0] : memref<8x256xf32, #tpu.memory_space<vmem>>, vector<8x256xf32>
    %c0_1 = arith.constant 0 : index
    %c0_2 = arith.constant 0 : index
    %c0_3 = arith.constant 0 : index
    %1 = vector.load %arg2[%c0_1, %c0_2, %c0_3] : memref<15x8x256xf32, #tpu.memory_space<vmem>>, vector<1x8x256xf32>
    %2 = vector.shape_cast %1 : vector<1x8x256xf32> to vector<8x256xf32>
    %c1 = arith.constant 1 : index
    %c0_4 = arith.constant 0 : index
    %c0_5 = arith.constant 0 : index
    %3 = vector.load %arg2[%c1, %c0_4, %c0_5] : memref<15x8x256xf32, #tpu.memory_space<vmem>>, vector<1x8x256xf32>
    %4 = vector.shape_cast %3 : vector<1x8x256xf32> to vector<8x256xf32>
    %5 = arith.addf %2, %4 : vector<8x256xf32>
    %c2 = arith.constant 2 : index
    %c0_6 = arith.constant 0 : index
    %c0_7 = arith.constant 0 : index
    %6 = vector.load %arg2[%c2, %c0_6, %c0_7] : memref<15x8x256xf32, #tpu.memory_space<vmem>>, vector<1x8x256xf32>
    %7 = vector.shape_cast %6 : vector<1x8x256xf32> to vector<8x256xf32>
    %8 = arith.addf %5, %7 : vector<8x256xf32>
    %c3 = arith.constant 3 : index
    %c0_8 = arith.constant 0 : index
    %c0_9 = arith.constant 0 : index
    %9 = vector.load %arg2[%c3, %c0_8, %c0_9] : memref<15x8x256xf32, #tpu.memory_space<vmem>>, vector<1x8x256xf32>
    %10 = vector.shape_cast %9 : vector<1x8x256xf32> to vector<8x256xf32>
    %11 = arith.addf %8, %10 : vector<8x256xf32>
    %c4 = arith.constant 4 : index
    %c0_10 = arith.constant 0 : index
    %c0_11 = arith.constant 0 : index
    %12 = vector.load %arg2[%c4, %c0_10, %c0_11] : memref<15x8x256xf32, #tpu.memory_space<vmem>>, vector<1x8x256xf32>
    %13 = vector.shape_cast %12 : vector<1x8x256xf32> to vector<8x256xf32>
    %14 = arith.addf %11, %13 : vector<8x256xf32>
    %c5 = arith.constant 5 : index
    %c0_12 = arith.constant 0 : index
    %c0_13 = arith.constant 0 : index
    %15 = vector.load %arg2[%c5, %c0_12, %c0_13] : memref<15x8x256xf32, #tpu.memory_space<vmem>>, vector<1x8x256xf32>
    %16 = vector.shape_cast %15 : vector<1x8x256xf32> to vector<8x256xf32>
    %17 = arith.addf %14, %16 : vector<8x256xf32>
    %c6 = arith.constant 6 : index
    %c0_14 = arith.constant 0 : index
    %c0_15 = arith.constant 0 : index
    %18 = vector.load %arg2[%c6, %c0_14, %c0_15] : memref<15x8x256xf32, #tpu.memory_space<vmem>>, vector<1x8x256xf32>
    %19 = vector.shape_cast %18 : vector<1x8x256xf32> to vector<8x256xf32>
    %20 = arith.addf %17, %19 : vector<8x256xf32>
    %c7 = arith.constant 7 : index
    %c0_16 = arith.constant 0 : index
    %c0_17 = arith.constant 0 : index
    %21 = vector.load %arg2[%c7, %c0_16, %c0_17] : memref<15x8x256xf32, #tpu.memory_space<vmem>>, vector<1x8x256xf32>
    %22 = vector.shape_cast %21 : vector<1x8x256xf32> to vector<8x256xf32>
    %23 = arith.addf %20, %22 : vector<8x256xf32>
    %c8 = arith.constant 8 : index
    %c0_18 = arith.constant 0 : index
    %c0_19 = arith.constant 0 : index
    %24 = vector.load %arg2[%c8, %c0_18, %c0_19] : memref<15x8x256xf32, #tpu.memory_space<vmem>>, vector<1x8x256xf32>
    %25 = vector.shape_cast %24 : vector<1x8x256xf32> to vector<8x256xf32>
    %26 = arith.addf %23, %25 : vector<8x256xf32>
    %c9 = arith.constant 9 : index
    %c0_20 = arith.constant 0 : index
    %c0_21 = arith.constant 0 : index
    %27 = vector.load %arg2[%c9, %c0_20, %c0_21] : memref<15x8x256xf32, #tpu.memory_space<vmem>>, vector<1x8x256xf32>
    %28 = vector.shape_cast %27 : vector<1x8x256xf32> to vector<8x256xf32>
    %29 = arith.addf %26, %28 : vector<8x256xf32>
    %c10 = arith.constant 10 : index
    %c0_22 = arith.constant 0 : index
    %c0_23 = arith.constant 0 : index
    %30 = vector.load %arg2[%c10, %c0_22, %c0_23] : memref<15x8x256xf32, #tpu.memory_space<vmem>>, vector<1x8x256xf32>
    %31 = vector.shape_cast %30 : vector<1x8x256xf32> to vector<8x256xf32>
    %32 = arith.addf %29, %31 : vector<8x256xf32>
    %c11 = arith.constant 11 : index
    %c0_24 = arith.constant 0 : index
    %c0_25 = arith.constant 0 : index
    %33 = vector.load %arg2[%c11, %c0_24, %c0_25] : memref<15x8x256xf32, #tpu.memory_space<vmem>>, vector<1x8x256xf32>
    %34 = vector.shape_cast %33 : vector<1x8x256xf32> to vector<8x256xf32>
    %35 = arith.addf %32, %34 : vector<8x256xf32>
    %c12 = arith.constant 12 : index
    %c0_26 = arith.constant 0 : index
    %c0_27 = arith.constant 0 : index
    %36 = vector.load %arg2[%c12, %c0_26, %c0_27] : memref<15x8x256xf32, #tpu.memory_space<vmem>>, vector<1x8x256xf32>
    %37 = vector.shape_cast %36 : vector<1x8x256xf32> to vector<8x256xf32>
    %38 = arith.addf %35, %37 : vector<8x256xf32>
    %c13 = arith.constant 13 : index
    %c0_28 = arith.constant 0 : index
    %c0_29 = arith.constant 0 : index
    %39 = vector.load %arg2[%c13, %c0_28, %c0_29] : memref<15x8x256xf32, #tpu.memory_space<vmem>>, vector<1x8x256xf32>
    %40 = vector.shape_cast %39 : vector<1x8x256xf32> to vector<8x256xf32>
    %41 = arith.addf %38, %40 : vector<8x256xf32>
    %c14 = arith.constant 14 : index
    %c0_30 = arith.constant 0 : index
    %c0_31 = arith.constant 0 : index
    %42 = vector.load %arg2[%c14, %c0_30, %c0_31] : memref<15x8x256xf32, #tpu.memory_space<vmem>>, vector<1x8x256xf32>
    %43 = vector.shape_cast %42 : vector<1x8x256xf32> to vector<8x256xf32>
    %44 = arith.addf %41, %43 : vector<8x256xf32>
    %45 = tpu.concatenate %0, %44 in 1 : vector<8x256xf32>, vector<8x256xf32> -> vector<8x512xf32>
    %46 = arith.truncf %45 : vector<8x512xf32> to vector<8x512xbf16>
    %c0_32 = arith.constant 0 : index
    %c0_33 = arith.constant 0 : index
    %47 = vector.load %arg3[%c0_32, %c0_33] : memref<512x128xbf16, #tpu.memory_space<vmem>>, vector<512x128xbf16>
    %cst = arith.constant dense<0.000000e+00> : vector<8x128xf32>
    %48 = tpu.matmul %46, %47, %cst {dimension_numbers = #tpu.dot_dimension_numbers<[1], [0], [0], [1], [0, 0, 1, 1], [], []>} : vector<8x512xbf16>, vector<512x128xbf16>, vector<8x128xf32> -> vector<8x128xf32>
    %c0_34 = arith.constant 0 : index
    %c0_35 = arith.constant 0 : index
    %49 = vector.load %arg4[%c0_34, %c0_35] : memref<8x128xf32, #tpu.memory_space<vmem>>, vector<8x128xf32>
    tpu.vector_store %arg4[%c0_34, %c0_35], %48 {strides = array<i32>} : memref<8x128xf32, #tpu.memory_space<vmem>>, vector<8x128xf32>,
    return
  }
  func.func @transform_0(%arg0: i32) -> (i32, i32) {
    %c0_i32 = arith.constant 0 : i32
    %c0_i32_0 = arith.constant 0 : i32
    return %arg0, %c0_i32 : i32, i32
  }
  func.func @transform_1(%arg0: i32) -> (i32, i32, i32) {
    %c0_i32 = arith.constant 0 : i32
    %c0_i32_0 = arith.constant 0 : i32
    %c0_i32_1 = arith.constant 0 : i32
    return %c0_i32, %arg0, %c0_i32_0 : i32, i32, i32
  }
  func.func @transform_2(%arg0: i32) -> (i32, i32) {
    %c0_i32 = arith.constant 0 : i32
    %c0_i32_0 = arith.constant 0 : i32
    %c0_i32_1 = arith.constant 0 : i32
    return %c0_i32, %c0_i32_0 : i32, i32
  }
  func.func @transform_3(%arg0: i32) -> (i32, i32) {
    %c0_i32 = arith.constant 0 : i32
    %c0_i32_0 = arith.constant 0 : i32
    return %arg0, %c0_i32 : i32, i32
  }
}

</mosaic_0001>

<bundles_post_ra>
// kernel: graphsage_forward.3
= control target key start
LH: loop header
LB: loop body
LE: loop exit
PB: predicated region body
PF: predicated region fallthrough
CT: control target
= control target key end

     0   :  { %vm71_vm0 = vcmask 130048   ;;  %s234_s2 = inlined_call_operand.vmem [shape: bf16[16,128], index: 2, kind: input, shape index: {}]   ;;  %s235_s0 = inlined_call_operand.vmem [shape: f32[8,16], index: 0, kind: input, shape index: {}]   ;;  %s236_s3 = inlined_call_operand.vmem [shape: bf16[16,128], index: 3, kind: input, shape index: {}]   ;;  %s237_s1 = inlined_call_operand.vmem [shape: f32[15,8,16], index: 1, kind: input, shape index: {}]   ;;  %s238_s4 = inlined_call_operand.vmem [shape: f32[8,256], index: 4, kind: output, shape index: {}]  }
   0x1   :  { %v145_v0 = vld [vmem:[%s234_s2] sm:$0xff]  ;;  %v121_v5 = vld [vmem:[%s237_s1 + $0x8] sm:$0xff]  ;;  %v122_v6 = vld [vmem:[%s237_s1 + $0x10] sm:$0xff] }
   0x2   :  { %v18_v1 = vld [vmem:[%s235_s0] sm:$0xff]  ;;  %82 = vmatpush.bf16.msra.mxu0 %v145_v0  ;;  %v123_v8 = vld [vmem:[%s237_s1 + $0x18] sm:$0xff]  ;;  %v125_v12 = vld [vmem:[%s237_s1 + $0x28] sm:$0xff] }
   0x3   :  { %v146_v2 = vld [vmem:[%s236_s3] sm:$0xff]  ;;  %v62_v3 = vpack.c.bf16 %v18_v1, %v18_v1  ;;  %v126_v14 = vld [vmem:[%s237_s1 + $0x30] sm:$0xff]  ;;  %v127_v16 = vld [vmem:[%s237_s1 + $0x38] sm:$0xff] }
   0x4   :  { %v19_v4 = vld [vmem:[%s237_s1] sm:$0xff]  ;;  %107 = vmatpush.bf16.msra.mxu1 %v146_v2  ;;  %v129_v20 = vld [vmem:[%s237_s1 + $0x48] sm:$0xff]  ;;  %v130_v22 = vld [vmem:[%s237_s1 + $0x50] sm:$0xff] }
   0x5   :  { %v22_v7 = vadd.f32 %v121_v5, %v19_v4  ;;  %139 = vmatmul.msk.bf16.vlgmr.msra.gmra.mxu0 %vm71_vm0, %v62_v3  ;;  %v124_v10 = vld [vmem:[%s237_s1 + $0x20] sm:$0xff]  ;;  %v131_v24 = vld [vmem:[%s237_s1 + $0x58] sm:$0xff]  ;;  %v133_v28 = vld [vmem:[%s237_s1 + $0x68] sm:$0xff] }
   0x6   :  { %v128_v18 = vld [vmem:[%s237_s1 + $0x40] sm:$0xff]  ;;  %v134_v30 = vld [vmem:[%s237_s1 + $0x70] sm:$0xff] }
   0x7   :  { %v25_v9 = vadd.f32 %v122_v6, %v22_v7  ;;  %v132_v26 = vld [vmem:[%s237_s1 + $0x60] sm:$0xff] }
   0x9   :  { %v28_v11 = vadd.f32 %v123_v8, %v25_v9 }
   0xb   :  { %v31_v13 = vadd.f32 %v124_v10, %v28_v11 }
   0xd   :  { %v34_v15 = vadd.f32 %v125_v12, %v31_v13 }
   0xf   :  { %v37_v17 = vadd.f32 %v126_v14, %v34_v15 }
  0x11   :  { %v40_v19 = vadd.f32 %v127_v16, %v37_v17 }
  0x13   :  { %v43_v21 = vadd.f32 %v128_v18, %v40_v19 }
  0x15   :  { %v46_v23 = vadd.f32 %v129_v20, %v43_v21 }
  0x17   :  { %v49_v25 = vadd.f32 %v130_v22, %v46_v23 }
  0x19   :  { %v52_v27 = vadd.f32 %v131_v24, %v49_v25 }
  0x1b   :  { %v55_v29 = vadd.f32 %v132_v26, %v52_v27 }
  0x1d   :  { %v58_v31 = vadd.f32 %v133_v28, %v55_v29 }
  0x1f   :  { %v61_v32 = vadd.f32 %v134_v30, %v58_v31 }
  0x21   :  { %v88_v33 = vpack.c.bf16 %v61_v32, %v61_v32 }
  0x23   :  { %144 = vmatmul.msk.bf16.vlgmr.msra.gmra.mxu1 %vm71_vm0, %v88_v33 }
  0x82   :  { %v84_v34 = vpop.f32.mrf.mxu0 }
  0x83   :  { %v113_v35 = vmax.f32 %v84_v34, 0.0 }
  0x85   :  { %115 = vst [vmem:[%s238_s4] sm:$0xff] %v113_v35 }
  0x8a   :  { %v86_v36 = vpop.f32.mrf.mxu0 }
  0xa0   :  { %v109_v37 = vpop.f32.mrf.mxu1 }
  0xa1   :  { %v114_v38 = vmax.f32 %v109_v37, 0.0 }
  0xa3   :  { %116 = vst [vmem:[%s238_s4 + $0x8] sm:$0xff] %v114_v38 }
  0xa8   :  { %v111_v39 = vpop.f32.mrf.mxu1 }

// kernel: graphsage_forward.4
= control target key start
LH: loop header
LB: loop body
LE: loop exit
PB: predicated region body
PF: predicated region fallthrough
CT: control target
= control target key end

     0   :  { %vm188_vm0 = vcmask 130048   ;;  %s908_s2 = inlined_call_operand.vmem [shape: bf16[16,128], index: 2, kind: input, shape index: {}]   ;;  %s909_s0 = inlined_call_operand.vmem [shape: f32[120,16], index: 0, kind: input, shape index: {}]   ;;  %s910_s3 = inlined_call_operand.vmem [shape: bf16[16,128], index: 3, kind: input, shape index: {}]   ;;  %s911_s1 = inlined_call_operand.vmem [shape: f32[5,120,16], index: 1, kind: input, shape index: {}]   ;;  %s912_s4 = inlined_call_operand.vmem [shape: f32[120,256], index: 4, kind: output, shape index: {}]  }
   0x1   :  { %v497_v0 = vld [vmem:[%s908_s2] sm:$0xff]  ;;  %v19_v2 = vld [vmem:[%s909_s0 + $0x8] sm:$0xff]  ;;  %v413_v10 = vld [vmem:[%s911_s1 + $0x78] sm:$0xff] }
   0x2   :  { %v18_v1 = vld [vmem:[%s909_s0] sm:$0xff]  ;;  %v27_v5 = vld [vmem:[%s909_s0 + $0x48] sm:$0xff]  ;;  %220 = vmatpush.bf16.msra.mxu0 %v497_v0  ;;  %499 = vmatpush.bf16.msra.mxu2 %v497_v0  ;;  %v428_v13 = vld [vmem:[%s911_s1 + $0xf0] sm:$0xff] }
   0x3   :  { %v172_v3 = vpack.c.bf16 %v19_v2, %v18_v1  ;;  %v26_v4 = vld [vmem:[%s909_s0 + $0x40] sm:$0xff]  ;;  %v34_v9 = vld [vmem:[%s911_s1 + $0x8] sm:$0xff]  ;;  %v429_v14 = vld [vmem:[%s911_s1 + $0xf8] sm:$0xff] }
   0x4   :  { %v498_v6 = vld [vmem:[%s910_s3] sm:$0xff]  ;;  %v176_v7 = vpack.c.bf16 %v27_v5, %v26_v4  ;;  %v443_v16 = vld [vmem:[%s911_s1 + $0x168] sm:$0xff]  ;;  %v444_v17 = vld [vmem:[%s911_s1 + $0x170] sm:$0xff] }
   0x5   :  { %v33_v8 = vld [vmem:[%s911_s1] sm:$0xff]  ;;  %308 = vmatpush.bf16.msra.mxu1 %v498_v6  ;;  %500 = vmatpush.bf16.msra.mxu3 %v498_v6  ;;  %v42_v21 = vld [vmem:[%s911_s1 + $0x48] sm:$0xff]  ;;  %v421_v23 = vld [vmem:[%s911_s1 + $0xb8] sm:$0xff] }
   0x6   :  { %v414_v11 = vld [vmem:[%s911_s1 + $0x80] sm:$0xff]  ;;  %v64_v12 = vadd.f32 %v413_v10, %v33_v8  ;;  %477 = vmatmul.msk.bf16.vlgmr.msra.gmra.mxu0 %vm188_vm0, %v172_v3  ;;  %481 = vmatmul.msk.bf16.vlgmr.msra.gmra.mxu2 %vm188_vm0, %v176_v7  ;;  %v436_v25 = vld [vmem:[%s911_s1 + $0x130] sm:$0xff]  ;;  %v459_v27 = vld [vmem:[%s911_s1 + $0x1e8] sm:$0xff] }
   0x7   :  { %v65_v15 = vadd.f32 %v414_v11, %v34_v9  ;;  %v458_v19 = vld [vmem:[%s911_s1 + $0x1e0] sm:$0xff]  ;;  %v437_v30 = vld [vmem:[%s911_s1 + $0x138] sm:$0xff]  ;;  %v451_v32 = vld [vmem:[%s911_s1 + $0x1a8] sm:$0xff] }
   0x8   :  { %v95_v18 = vadd.f32 %v428_v13, %v64_v12  ;;  %v41_v20 = vld [vmem:[%s911_s1 + $0x40] sm:$0xff]  ;;  %v452_v33 = vld [vmem:[%s911_s1 + $0x1b0] sm:$0xff]  ;;  %v467_v38 = vld [vmem:[%s911_s1 + $0x228] sm:$0xff] }
   0x9   :  { %v96_v22 = vadd.f32 %v429_v14, %v65_v15  ;;  %v422_v24 = vld [vmem:[%s911_s1 + $0xc0] sm:$0xff]  ;;  %v72_v28 = vadd.f32 %v421_v23, %v41_v20  ;;  %v35_v40 = vld [vmem:[%s911_s1 + $0x10] sm:$0xff]  ;;  %v36_v41 = vld [vmem:[%s911_s1 + $0x18] sm:$0xff] }
   0xa   :  { %v126_v26 = vadd.f32 %v443_v16, %v95_v18  ;;  %v73_v29 = vadd.f32 %v422_v24, %v42_v21  ;;  %v466_v37 = vld [vmem:[%s911_s1 + $0x220] sm:$0xff]  ;;  %v415_v42 = vld [vmem:[%s911_s1 + $0x88] sm:$0xff]  ;;  %v416_v45 = vld [vmem:[%s911_s1 + $0x90] sm:$0xff] }
   0xb   :  { %v127_v31 = vadd.f32 %v444_v17, %v96_v22  ;;  %v103_v35 = vadd.f32 %v436_v25, %v72_v28  ;;  %v66_v46 = vadd.f32 %v415_v42, %v35_v40  ;;  %v430_v47 = vld [vmem:[%s911_s1 + $0x100] sm:$0xff]  ;;  %v431_v48 = vld [vmem:[%s911_s1 + $0x108] sm:$0xff]  ;;  %v20_v50 = vld [vmem:[%s909_s0 + $0x10] sm:$0xff]  ;;  %v67_v53 = vadd.f32 %v416_v45, %v36_v41 }
   0xc   :  { %v157_v34 = vadd.f32 %v458_v19, %v126_v26  ;;  %v104_v36 = vadd.f32 %v437_v30, %v73_v29  ;;  %v21_v51 = vld [vmem:[%s909_s0 + $0x18] sm:$0xff]  ;;  %v28_v52 = vld [vmem:[%s909_s0 + $0x50] sm:$0xff]  ;;  %v423_v61 = vld [vmem:[%s911_s1 + $0xc8] sm:$0xff] }
   0xd   :  { %v158_v39 = vadd.f32 %v459_v27, %v127_v31  ;;  %v134_v43 = vadd.f32 %v451_v32, %v103_v35  ;;  %v29_v56 = vld [vmem:[%s909_s0 + $0x58] sm:$0xff]  ;;  %v43_v57 = vld [vmem:[%s911_s1 + $0x50] sm:$0xff]  ;;  %v97_v59 = vadd.f32 %v430_v47, %v66_v46  ;;  %v98_v60 = vadd.f32 %v431_v48, %v67_v53  ;;  %v438_v63 = vld [vmem:[%s911_s1 + $0x140] sm:$0xff] }
   0xe   :  { %v135_v44 = vadd.f32 %v452_v33, %v104_v36  ;;  %v44_v58 = vld [vmem:[%s911_s1 + $0x58] sm:$0xff]  ;;  %v424_v62 = vld [vmem:[%s911_s1 + $0xd0] sm:$0xff]  ;;  %v446_v2 = vld [vmem:[%s911_s1 + $0x180] sm:$0xff]  ;;  %v74_v3 = vadd.f32 %v423_v61, %v43_v57  ;;  %v173_v6 = vpack.c.bf16 %v21_v51, %v20_v50  ;;  %v177_v7 = vpack.c.bf16 %v29_v56, %v28_v52 }
   0xf   :  { %v261_v49 = vpack.c.bf16 %v158_v39, %v157_v34  ;;  %v165_v54 = vadd.f32 %v466_v37, %v134_v43  ;;  %v445_v1 = vld [vmem:[%s911_s1 + $0x178] sm:$0xff]  ;;  %v75_v4 = vadd.f32 %v424_v62, %v44_v58  ;;  %v439_v5 = vld [vmem:[%s911_s1 + $0x148] sm:$0xff]  ;;  %v129_v11 = vadd.f32 %v446_v2, %v98_v60  ;;  %v454_v13 = vld [vmem:[%s911_s1 + $0x1c0] sm:$0xff] }
  0x10   :  { %v166_v55 = vadd.f32 %v467_v38, %v135_v44  ;;  %v105_v8 = vadd.f32 %v438_v63, %v74_v3  ;;  %v128_v10 = vadd.f32 %v445_v1, %v97_v59  ;;  %v453_v12 = vld [vmem:[%s911_s1 + $0x1b8] sm:$0xff]  ;;  %v460_v14 = vld [vmem:[%s911_s1 + $0x1f0] sm:$0xff]  ;;  %v37_v22 = vld [vmem:[%s911_s1 + $0x20] sm:$0xff] }
  0x11   :  { %489 = vmatmul.msk.bf16.vlgmr.msra.gmra.mxu1 %vm188_vm0, %v261_v49  ;;  %v106_v9 = vadd.f32 %v439_v5, %v75_v4  ;;  %v461_v15 = vld [vmem:[%s911_s1 + $0x1f8] sm:$0xff]  ;;  %v468_v20 = vld [vmem:[%s911_s1 + $0x230] sm:$0xff]  ;;  %v38_v23 = vld [vmem:[%s911_s1 + $0x28] sm:$0xff] }
  0x12   :  { %v265_v0 = vpack.c.bf16 %v166_v55, %v165_v54  ;;  %v136_v16 = vadd.f32 %v453_v12, %v105_v8  ;;  %v159_v18 = vadd.f32 %v460_v14, %v128_v10  ;;  %v160_v19 = vadd.f32 %v461_v15, %v129_v11  ;;  %v469_v21 = vld [vmem:[%s911_s1 + $0x238] sm:$0xff]  ;;  %v418_v25 = vld [vmem:[%s911_s1 + $0xa0] sm:$0xff]  ;;  %v46_v32 = vld [vmem:[%s911_s1 + $0x68] sm:$0xff] }
  0x13   :  { %v137_v17 = vadd.f32 %v454_v13, %v106_v9  ;;  %v417_v24 = vld [vmem:[%s911_s1 + $0x98] sm:$0xff]  ;;  %v45_v28 = vld [vmem:[%s911_s1 + $0x60] sm:$0xff]  ;;  %v69_v31 = vadd.f32 %v418_v25, %v38_v23  ;;  %v432_v35 = vld [vmem:[%s911_s1 + $0x110] sm:$0xff] }
  0x14   :  { %493 = vmatmul.msk.bf16.vlgmr.msra.gmra.mxu3 %vm188_vm0, %v265_v0  ;;  %v167_v26 = vadd.f32 %v468_v20, %v136_v16  ;;  %v262_v29 = vpack.c.bf16 %v160_v19, %v159_v18  ;;  %v68_v30 = vadd.f32 %v417_v24, %v37_v22  ;;  %v425_v33 = vld [vmem:[%s911_s1 + $0xd8] sm:$0xff]  ;;  %v426_v34 = vld [vmem:[%s911_s1 + $0xe0] sm:$0xff]  ;;  %v23_v39 = vld [vmem:[%s909_s0 + $0x28] sm:$0xff] }
  0x15   :  { %v168_v27 = vadd.f32 %v469_v21, %v137_v17  ;;  %v433_v36 = vld [vmem:[%s911_s1 + $0x118] sm:$0xff]  ;;  %v22_v38 = vld [vmem:[%s909_s0 + $0x20] sm:$0xff]  ;;  %v76_v41 = vadd.f32 %v425_v33, %v45_v28  ;;  %v77_v42 = vadd.f32 %v426_v34, %v46_v32  ;;  %v31_v43 = vld [vmem:[%s909_s0 + $0x68] sm:$0xff] }
  0x16   :  { %478 = vmatmul.msk.bf16.gmra.mxu0 %vm188_vm0, %v173_v6  ;;  %482 = vmatmul.msk.bf16.gmra.mxu2 %vm188_vm0, %v177_v7  ;;  %v30_v40 = vld [vmem:[%s909_s0 + $0x60] sm:$0xff]  ;;  %v99_v44 = vadd.f32 %v432_v35, %v68_v30  ;;  %v100_v45 = vadd.f32 %v433_v36, %v69_v31  ;;  %v440_v46 = vld [vmem:[%s911_s1 + $0x150] sm:$0xff]  ;;  %v441_v47 = vld [vmem:[%s911_s1 + $0x158] sm:$0xff]  ;;  %v174_v50 = vpack.c.bf16 %v23_v39, %v22_v38 }
  0x17   :  { %v266_v37 = vpack.c.bf16 %v168_v27, %v167_v26  ;;  %v447_v48 = vld [vmem:[%s911_s1 + $0x188] sm:$0xff]  ;;  %v448_v49 = vld [vmem:[%s911_s1 + $0x190] sm:$0xff]  ;;  %v178_v51 = vpack.c.bf16 %v31_v43, %v30_v40  ;;  %v107_v52 = vadd.f32 %v440_v46, %v76_v41  ;;  %v108_v53 = vadd.f32 %v441_v47, %v77_v42  ;;  %v462_v58 = vld [vmem:[%s911_s1 + $0x200] sm:$0xff] }
  0x18   :  { %v130_v54 = vadd.f32 %v447_v48, %v99_v44  ;;  %v131_v55 = vadd.f32 %v448_v49, %v100_v45  ;;  %v455_v56 = vld [vmem:[%s911_s1 + $0x1c8] sm:$0xff]  ;;  %v456_v57 = vld [vmem:[%s911_s1 + $0x1d0] sm:$0xff]  ;;  %v470_v0 = vld [vmem:[%s911_s1 + $0x240] sm:$0xff] }
  0x19   :  { %v463_v59 = vld [vmem:[%s911_s1 + $0x208] sm:$0xff]  ;;  %v138_v60 = vadd.f32 %v455_v56, %v107_v52  ;;  %v139_v61 = vadd.f32 %v456_v57, %v108_v53  ;;  %v39_v2 = vld [vmem:[%s911_s1 + $0x30] sm:$0xff]  ;;  %v40_v3 = vld [vmem:[%s911_s1 + $0x38] sm:$0xff] }
  0x1a   :  { %v161_v62 = vadd.f32 %v462_v58, %v130_v54  ;;  %v162_v63 = vadd.f32 %v463_v59, %v131_v55  ;;  %v471_v1 = vld [vmem:[%s911_s1 + $0x248] sm:$0xff]  ;;  %v420_v5 = vld [vmem:[%s911_s1 + $0xb0] sm:$0xff]  ;;  %v434_v13 = vld [vmem:[%s911_s1 + $0x120] sm:$0xff] }
  0x1b   :  { %v419_v4 = vld [vmem:[%s911_s1 + $0xa8] sm:$0xff]  ;;  %v169_v6 = vadd.f32 %v470_v0, %v138_v60  ;;  %v170_v7 = vadd.f32 %v471_v1, %v139_v61  ;;  %v71_v10 = vadd.f32 %v420_v5, %v40_v3  ;;  %v47_v11 = vld [vmem:[%s911_s1 + $0x70] sm:$0xff]  ;;  %v25_v18 = vld [vmem:[%s909_s0 + $0x38] sm:$0xff] }
  0x1c   :  { %v263_v8 = vpack.c.bf16 %v162_v63, %v161_v62  ;;  %v70_v9 = vadd.f32 %v419_v4, %v39_v2  ;;  %v427_v12 = vld [vmem:[%s911_s1 + $0xe8] sm:$0xff]  ;;  %v24_v16 = vld [vmem:[%s909_s0 + $0x30] sm:$0xff]  ;;  %v442_v22 = vld [vmem:[%s911_s1 + $0x160] sm:$0xff] }
  0x1d   :  { %v435_v14 = vld [vmem:[%s911_s1 + $0x128] sm:$0xff]  ;;  %v267_v15 = vpack.c.bf16 %v170_v7, %v169_v6  ;;  %v78_v17 = vadd.f32 %v427_v12, %v47_v11  ;;  %v32_v19 = vld [vmem:[%s909_s0 + $0x70] sm:$0xff]  ;;  %v449_v23 = vld [vmem:[%s911_s1 + $0x198] sm:$0xff]  ;;  %v175_v25 = vpack.c.bf16 %v25_v18, %v24_v16 }
  0x1e   :  { %v101_v20 = vadd.f32 %v434_v13, %v70_v9  ;;  %v102_v21 = vadd.f32 %v435_v14, %v71_v10  ;;  %v450_v24 = vld [vmem:[%s911_s1 + $0x1a0] sm:$0xff]  ;;  %v179_v26 = vpack.c.bf16 %v32_v19, %v32_v19  ;;  %v457_v30 = vld [vmem:[%s911_s1 + $0x1d8] sm:$0xff]  ;;  %v464_v31 = vld [vmem:[%s911_s1 + $0x210] sm:$0xff] }
  0x1f   :  { %v109_v27 = vadd.f32 %v442_v22, %v78_v17  ;;  %v465_v32 = vld [vmem:[%s911_s1 + $0x218] sm:$0xff]  ;;  %v472_v36 = vld [vmem:[%s911_s1 + $0x250] sm:$0xff] }
  0x20   :  { %v132_v28 = vadd.f32 %v449_v23, %v101_v20 }
  0x21   :  { %490 = vmatmul.msk.bf16.gmra.mxu1 %vm188_vm0, %v262_v29  ;;  %v133_v29 = vadd.f32 %v450_v24, %v102_v21  ;;  %v140_v33 = vadd.f32 %v457_v30, %v109_v27 }
  0x22   :  { %v163_v34 = vadd.f32 %v464_v31, %v132_v28 }
  0x23   :  { %v164_v35 = vadd.f32 %v465_v32, %v133_v29 }
  0x24   :  { %494 = vmatmul.msk.bf16.gmra.mxu3 %vm188_vm0, %v266_v37  ;;  %v171_v37 = vadd.f32 %v472_v36, %v140_v33 }
  0x25   :  { %v264_v38 = vpack.c.bf16 %v164_v35, %v163_v34 }
  0x26   :  { %479 = vmatmul.msk.bf16.gmra.mxu0 %vm188_vm0, %v174_v50  ;;  %483 = vmatmul.msk.bf16.gmra.mxu2 %vm188_vm0, %v178_v51  ;;  %v268_v39 = vpack.c.bf16 %v171_v37, %v171_v37 }
  0x31   :  { %491 = vmatmul.msk.bf16.gmra.mxu1 %vm188_vm0, %v263_v8 }
  0x34   :  { %495 = vmatmul.msk.bf16.gmra.mxu3 %vm188_vm0, %v267_v15 }
  0x36   :  { %480 = vmatmul.msk.bf16.gmra.mxu0 %vm188_vm0, %v175_v25  ;;  %484 = vmatmul.msk.bf16.gmra.mxu2 %vm188_vm0, %v179_v26 }
  0x41   :  { %492 = vmatmul.msk.bf16.gmra.mxu1 %vm188_vm0, %v264_v38 }
  0x44   :  { %496 = vmatmul.msk.bf16.gmra.mxu3 %vm188_vm0, %v268_v39 }
  0x83   :  { %v222_v40 = vpop.f32.mrf.mxu0 }
  0x84   :  { %v349_v41 = vmax.f32 %v222_v40, 0.0 }
  0x86   :  { %379 = vst [vmem:[%s912_s4] sm:$0xff] %v349_v41 }
  0x89   :  { %v242_v42 = vpop.f32.mrf.mxu2 }
  0x8a   :  { %v357_v43 = vmax.f32 %v242_v42, 0.0 }
  0x8b   :  { %v224_v44 = vpop.f32.mrf.mxu0 }
  0x8c   :  { %387 = vst [vmem:[%s912_s4 + $0x80] sm:$0xff] %v357_v43  ;;  %v350_v46 = vmax.f32 %v224_v44, 0.0 }
  0x8e   :  { %v310_v45 = vpop.f32.mrf.mxu1  ;;  %380 = vst [vmem:[%s912_s4 + $0x10] sm:$0xff] %v350_v46 }
  0x8f   :  { %v364_v47 = vmax.f32 %v310_v45, 0.0 }
  0x91   :  { %394 = vst [vmem:[%s912_s4 + $0x8] sm:$0xff] %v364_v47  ;;  %v244_v48 = vpop.f32.mrf.mxu2 }
  0x92   :  { %v358_v49 = vmax.f32 %v244_v48, 0.0 }
  0x93   :  { %v227_v50 = vpop.f32.mrf.mxu0 }
  0x94   :  { %388 = vst [vmem:[%s912_s4 + $0x90] sm:$0xff] %v358_v49  ;;  %v351_v52 = vmax.f32 %v227_v50, 0.0 }
  0x96   :  { %v312_v51 = vpop.f32.mrf.mxu1  ;;  %381 = vst [vmem:[%s912_s4 + $0x20] sm:$0xff] %v351_v52 }
  0x97   :  { %v330_v53 = vpop.f32.mrf.mxu3  ;;  %v365_v54 = vmax.f32 %v312_v51, 0.0 }
  0x98   :  { %v372_v55 = vmax.f32 %v330_v53, 0.0 }
  0x99   :  { %395 = vst [vmem:[%s912_s4 + $0x18] sm:$0xff] %v365_v54  ;;  %v247_v56 = vpop.f32.mrf.mxu2 }
  0x9a   :  { %402 = vst [vmem:[%s912_s4 + $0x88] sm:$0xff] %v372_v55  ;;  %v359_v57 = vmax.f32 %v247_v56, 0.0 }
  0x9b   :  { %v229_v58 = vpop.f32.mrf.mxu0 }
  0x9c   :  { %389 = vst [vmem:[%s912_s4 + $0xa0] sm:$0xff] %v359_v57  ;;  %v352_v60 = vmax.f32 %v229_v58, 0.0 }
  0x9e   :  { %v315_v59 = vpop.f32.mrf.mxu1  ;;  %382 = vst [vmem:[%s912_s4 + $0x30] sm:$0xff] %v352_v60 }
  0x9f   :  { %v332_v61 = vpop.f32.mrf.mxu3  ;;  %v366_v62 = vmax.f32 %v315_v59, 0.0 }
  0xa0   :  { %v373_v63 = vmax.f32 %v332_v61, 0.0 }
  0xa1   :  { %396 = vst [vmem:[%s912_s4 + $0x28] sm:$0xff] %v366_v62  ;;  %v249_v0 = vpop.f32.mrf.mxu2 }
  0xa2   :  { %403 = vst [vmem:[%s912_s4 + $0x98] sm:$0xff] %v373_v63  ;;  %v360_v1 = vmax.f32 %v249_v0, 0.0 }
  0xa3   :  { %v232_v2 = vpop.f32.mrf.mxu0 }
  0xa4   :  { %390 = vst [vmem:[%s912_s4 + $0xb0] sm:$0xff] %v360_v1  ;;  %v353_v4 = vmax.f32 %v232_v2, 0.0 }
  0xa6   :  { %v317_v3 = vpop.f32.mrf.mxu1  ;;  %383 = vst [vmem:[%s912_s4 + $0x40] sm:$0xff] %v353_v4 }
  0xa7   :  { %v335_v5 = vpop.f32.mrf.mxu3  ;;  %v367_v6 = vmax.f32 %v317_v3, 0.0 }
  0xa8   :  { %v374_v7 = vmax.f32 %v335_v5, 0.0 }
  0xa9   :  { %397 = vst [vmem:[%s912_s4 + $0x38] sm:$0xff] %v367_v6  ;;  %v252_v8 = vpop.f32.mrf.mxu2 }
  0xaa   :  { %404 = vst [vmem:[%s912_s4 + $0xa8] sm:$0xff] %v374_v7  ;;  %v361_v9 = vmax.f32 %v252_v8, 0.0 }
  0xab   :  { %v234_v10 = vpop.f32.mrf.mxu0 }
  0xac   :  { %391 = vst [vmem:[%s912_s4 + $0xc0] sm:$0xff] %v361_v9  ;;  %v354_v12 = vmax.f32 %v234_v10, 0.0 }
  0xae   :  { %v320_v11 = vpop.f32.mrf.mxu1  ;;  %384 = vst [vmem:[%s912_s4 + $0x50] sm:$0xff] %v354_v12 }
  0xaf   :  { %v337_v13 = vpop.f32.mrf.mxu3  ;;  %v368_v14 = vmax.f32 %v320_v11, 0.0 }
  0xb0   :  { %v375_v15 = vmax.f32 %v337_v13, 0.0 }
  0xb1   :  { %398 = vst [vmem:[%s912_s4 + $0x48] sm:$0xff] %v368_v14  ;;  %v254_v16 = vpop.f32.mrf.mxu2 }
  0xb2   :  { %405 = vst [vmem:[%s912_s4 + $0xb8] sm:$0xff] %v375_v15  ;;  %v362_v17 = vmax.f32 %v254_v16, 0.0 }
  0xb3   :  { %v237_v18 = vpop.f32.mrf.mxu0 }
  0xb4   :  { %392 = vst [vmem:[%s912_s4 + $0xd0] sm:$0xff] %v362_v17  ;;  %v355_v20 = vmax.f32 %v237_v18, 0.0 }
  0xb6   :  { %v322_v19 = vpop.f32.mrf.mxu1  ;;  %385 = vst [vmem:[%s912_s4 + $0x60] sm:$0xff] %v355_v20 }
  0xb7   :  { %v340_v21 = vpop.f32.mrf.mxu3  ;;  %v369_v22 = vmax.f32 %v322_v19, 0.0 }
  0xb8   :  { %v376_v23 = vmax.f32 %v340_v21, 0.0 }
  0xb9   :  { %399 = vst [vmem:[%s912_s4 + $0x58] sm:$0xff] %v369_v22  ;;  %v257_v24 = vpop.f32.mrf.mxu2 }
  0xba   :  { %406 = vst [vmem:[%s912_s4 + $0xc8] sm:$0xff] %v376_v23  ;;  %v363_v25 = vmax.f32 %v257_v24, 0.0 }
  0xbb   :  { %v239_v26 = vpop.f32.mrf.mxu0 }
  0xbc   :  { %393 = vst [vmem:[%s912_s4 + $0xe0] sm:$0xff] %v363_v25  ;;  %v356_v28 = vmax.f32 %v239_v26, 0.0 }
  0xbe   :  { %v325_v27 = vpop.f32.mrf.mxu1  ;;  %386 = vst [vmem:[%s912_s4 + $0x70] sm:$0xff] %v356_v28 }
  0xbf   :  { %v342_v29 = vpop.f32.mrf.mxu3  ;;  %v370_v30 = vmax.f32 %v325_v27, 0.0 }
  0xc0   :  { %v377_v31 = vmax.f32 %v342_v29, 0.0 }
  0xc1   :  { %400 = vst [vmem:[%s912_s4 + $0x68] sm:$0xff] %v370_v30  ;;  %v259_v32 = vpop.f32.mrf.mxu2 }
  0xc2   :  { %407 = vst [vmem:[%s912_s4 + $0xd8] sm:$0xff] %v377_v31 }
  0xc6   :  { %v327_v33 = vpop.f32.mrf.mxu1 }
  0xc7   :  { %v345_v34 = vpop.f32.mrf.mxu3  ;;  %v371_v35 = vmax.f32 %v327_v33, 0.0 }
  0xc8   :  { %v378_v36 = vmax.f32 %v345_v34, 0.0 }
  0xc9   :  { %401 = vst [vmem:[%s912_s4 + $0x78] sm:$0xff] %v371_v35 }
  0xca   :  { %408 = vst [vmem:[%s912_s4 + $0xe8] sm:$0xff] %v378_v36 }
  0xcf   :  { %v347_v37 = vpop.f32.mrf.mxu3 }

// kernel: graphsage_forward.5
= control target key start
LH: loop header
LB: loop body
LE: loop exit
PB: predicated region body
PF: predicated region fallthrough
CT: control target
= control target key end

     0   :  { %s849_s0 = inlined_call_operand.vmem [shape: f32[8,256], index: 0, kind: input, shape index: {}]   ;;  %s850_s1 = inlined_call_operand.vmem [shape: f32[15,8,256], index: 1, kind: input, shape index: {}]   ;;  %s851_s2 = inlined_call_operand.vmem [shape: bf16[512,128], index: 2, kind: input, shape index: {}]   ;;  %s852_s3 = inlined_call_operand.hbm [shape: f32[8,128], index: 3, kind: output, shape index: {}]  }
   0x1   :  { %v581_v0 = vld [vmem:[%s851_s2 + $0x38] sm:$0xff]  ;;  %v580_v4 = vld [vmem:[%s851_s2 + $0x30] sm:$0xff]  ;;  %v579_v8 = vld [vmem:[%s851_s2 + $0x28] sm:$0xff] }
   0x2   :  { %v589_v1 = vld [vmem:[%s851_s2 + $0x78] sm:$0xff]  ;;  %349 = vmatpush.bf16.msra.mxu0 %v581_v0  ;;  %v588_v5 = vld [vmem:[%s851_s2 + $0x70] sm:$0xff]  ;;  %v587_v9 = vld [vmem:[%s851_s2 + $0x68] sm:$0xff] }
   0x3   :  { %v597_v2 = vld [vmem:[%s851_s2 + $0xb8] sm:$0xff]  ;;  %362 = vmatpush.bf16.msra.mxu1 %v589_v1  ;;  %v596_v6 = vld [vmem:[%s851_s2 + $0xb0] sm:$0xff]  ;;  %v595_v10 = vld [vmem:[%s851_s2 + $0xa8] sm:$0xff] }
   0x4   :  { %v605_v3 = vld [vmem:[%s851_s2 + $0xf8] sm:$0xff]  ;;  %375 = vmatpush.bf16.msra.mxu2 %v597_v2  ;;  %v604_v7 = vld [vmem:[%s851_s2 + $0xf0] sm:$0xff]  ;;  %v603_v11 = vld [vmem:[%s851_s2 + $0xe8] sm:$0xff] }
   0x5   :  { %388 = vmatpush.bf16.msra.mxu3 %v605_v3  ;;  %v578_v12 = vld [vmem:[%s851_s2 + $0x20] sm:$0xff]  ;;  %v418_v17 = vld [vmem:[%s850_s1 + $0x10] sm:$0xff]  ;;  %v577_v21 = vld [vmem:[%s851_s2 + $0x18] sm:$0xff] }
   0x6   :  { %350 = vmatpush.bf16.msra.mxu0 %v580_v4  ;;  %v586_v13 = vld [vmem:[%s851_s2 + $0x60] sm:$0xff]  ;;  %v422_v20 = vld [vmem:[%s850_s1 + $0x30] sm:$0xff]  ;;  %v585_v22 = vld [vmem:[%s851_s2 + $0x58] sm:$0xff] }
   0x7   :  { %363 = vmatpush.bf16.msra.mxu1 %v588_v5  ;;  %v594_v14 = vld [vmem:[%s851_s2 + $0xa0] sm:$0xff]  ;;  %v593_v24 = vld [vmem:[%s851_s2 + $0x98] sm:$0xff]  ;;  %v18_v28 = vld [vmem:[%s850_s1 + $0x8] sm:$0xff] }
   0x8   :  { %376 = vmatpush.bf16.msra.mxu2 %v596_v6  ;;  %v602_v15 = vld [vmem:[%s851_s2 + $0xe0] sm:$0xff]  ;;  %v601_v25 = vld [vmem:[%s851_s2 + $0xd8] sm:$0xff]  ;;  %v426_v30 = vld [vmem:[%s850_s1 + $0x50] sm:$0xff] }
   0x9   :  { %389 = vmatpush.bf16.msra.mxu3 %v604_v7  ;;  %v17_v16 = vld [vmem:[%s850_s1] sm:$0xff]  ;;  %v419_v29 = vld [vmem:[%s850_s1 + $0x18] sm:$0xff]  ;;  %v421_v32 = vld [vmem:[%s850_s1 + $0x28] sm:$0xff] }
   0xa   :  { %351 = vmatpush.bf16.msra.mxu0 %v579_v8  ;;  %v22_v18 = vadd.f32 %v418_v17, %v17_v16  ;;  %v420_v19 = vld [vmem:[%s850_s1 + $0x20] sm:$0xff]  ;;  %v23_v31 = vadd.f32 %v419_v29, %v18_v28  ;;  %v576_v33 = vld [vmem:[%s851_s2 + $0x10] sm:$0xff]  ;;  %v423_v36 = vld [vmem:[%s850_s1 + $0x38] sm:$0xff] }
   0xb   :  { %364 = vmatpush.bf16.msra.mxu1 %v587_v9  ;;  %v424_v26 = vld [vmem:[%s850_s1 + $0x40] sm:$0xff]  ;;  %v584_v34 = vld [vmem:[%s851_s2 + $0x50] sm:$0xff]  ;;  %v425_v42 = vld [vmem:[%s850_s1 + $0x48] sm:$0xff] }
   0xc   :  { %377 = vmatpush.bf16.msra.mxu2 %v595_v10  ;;  %v27_v23 = vadd.f32 %v420_v19, %v22_v18  ;;  %v592_v37 = vld [vmem:[%s851_s2 + $0x90] sm:$0xff]  ;;  %v428_v39 = vld [vmem:[%s850_s1 + $0x60] sm:$0xff]  ;;  %v28_v40 = vadd.f32 %v421_v32, %v23_v31 }
   0xd   :  { %390 = vmatpush.bf16.msra.mxu3 %v603_v11  ;;  %v600_v38 = vld [vmem:[%s851_s2 + $0xd0] sm:$0xff] }
   0xe   :  { %352 = vmatpush.bf16.msra.mxu0 %v578_v12  ;;  %v32_v27 = vadd.f32 %v422_v20, %v27_v23  ;;  %v430_v43 = vld [vmem:[%s850_s1 + $0x70] sm:$0xff]  ;;  %v33_v44 = vadd.f32 %v423_v36, %v28_v40 }
   0xf   :  { %365 = vmatpush.bf16.msra.mxu1 %v586_v13 }
  0x10   :  { %378 = vmatpush.bf16.msra.mxu2 %v594_v14  ;;  %v37_v35 = vadd.f32 %v424_v26, %v32_v27 }
  0x11   :  { %391 = vmatpush.bf16.msra.mxu3 %v602_v15 }
  0x12   :  { %353 = vmatpush.bf16.msra.mxu0 %v577_v21  ;;  %v42_v41 = vadd.f32 %v426_v30, %v37_v35 }
  0x13   :  { %366 = vmatpush.bf16.msra.mxu1 %v585_v22 }
  0x14   :  { %379 = vmatpush.bf16.msra.mxu2 %v593_v24 }
  0x15   :  { %392 = vmatpush.bf16.msra.mxu3 %v601_v25 }
  0x16   :  { %8 = vsyncpa [#allocation3], 0  ;;  %354 = vmatpush.bf16.msra.mxu0 %v576_v33  ;;  %v575_v45 = vld [vmem:[%s851_s2 + $0x8] sm:$0xff]  ;;  %v47_v47 = vadd.f32 %v428_v39, %v42_v41  ;;  %v427_v48 = vld [vmem:[%s850_s1 + $0x58] sm:$0xff]  ;;  %v38_v52 = vadd.f32 %v425_v42, %v33_v44  ;;  %s633_s30 = smov [#allocation2]   ;;  %s409_s7 = sshll.u32 %s852_s3, 4  ;;  %s410_s7 = int_to_ptr.hbm [resolvable:$true] %s409_s7 }
  0x17   :  { %367 = vmatpush.bf16.msra.mxu1 %v584_v34  ;;  %v583_v46 = vld [vmem:[%s851_s2 + $0x48] sm:$0xff]  ;;  %v432_v51 = vld [vmem:[%s850_s1 + $0x80] sm:$0xff]  ;;  %v434_v57 = vld [vmem:[%s850_s1 + $0x90] sm:$0xff]  ;;  %s407_s4 = sshll.u32 %s633_s30, 4  ;;  %s408_s4 = int_to_ptr.vmem [resolvable:$true] %s407_s4 }
  0x18   :  { %380 = vmatpush.bf16.msra.mxu2 %v592_v37  ;;  %v591_v49 = vld [vmem:[%s851_s2 + $0x88] sm:$0xff]  ;;  %v52_v53 = vadd.f32 %v430_v43, %v47_v47  ;;  %v574_v55 = vld [vmem:[%s851_s2] sm:$0xff]  ;;  %v43_v58 = vadd.f32 %v427_v48, %v38_v52  ;;  %v431_v62 = vld [vmem:[%s850_s1 + $0x78] sm:$0xff] }
  0x19   :  { %393 = vmatpush.bf16.msra.mxu3 %v600_v38  ;;  %v599_v50 = vld [vmem:[%s851_s2 + $0xc8] sm:$0xff]  ;;  %v582_v56 = vld [vmem:[%s851_s2 + $0x40] sm:$0xff]  ;;  %v438_v7 = vld [vmem:[%s850_s1 + $0xb0] sm:$0xff] }
  0x1a   :  { %v429_v54 = vld [vmem:[%s850_s1 + $0x68] sm:$0xff]  ;;  %355 = vmatpush.bf16.msra.mxu0 %v575_v45  ;;  %v15_v59 = vld [vmem:[%s849_s0] sm:$0xff]  ;;  %v57_v61 = vadd.f32 %v432_v51, %v52_v53  ;;  %v435_v10 = vld [vmem:[%s850_s1 + $0x98] sm:$0xff] }
  0x1b   :  { %368 = vmatpush.bf16.msra.mxu1 %v583_v46  ;;  %v16_v60 = vld [vmem:[%s849_s0 + $0x8] sm:$0xff]  ;;  %v590_v63 = vld [vmem:[%s851_s2 + $0x80] sm:$0xff]  ;;  %v48_v2 = vadd.f32 %v429_v54, %v43_v58  ;;  %v89_v5 = vpack.c.bf16 %v15_v59, %v15_v59  ;;  %v442_v15 = vld [vmem:[%s850_s1 + $0xd0] sm:$0xff] }
  0x1c   :  { %381 = vmatpush.bf16.msra.mxu2 %v591_v49  ;;  %v598_v0 = vld [vmem:[%s851_s2 + $0xc0] sm:$0xff]  ;;  %v62_v3 = vadd.f32 %v434_v57, %v57_v61  ;;  %v433_v4 = vld [vmem:[%s850_s1 + $0x88] sm:$0xff]  ;;  %v90_v6 = vpack.c.bf16 %v16_v60, %v16_v60  ;;  %v439_v18 = vld [vmem:[%s850_s1 + $0xb8] sm:$0xff] }
  0x1d   :  { %394 = vmatpush.bf16.msra.mxu3 %v599_v50  ;;  %v436_v1 = vld [vmem:[%s850_s1 + $0xa0] sm:$0xff]  ;;  %v53_v8 = vadd.f32 %v431_v62, %v48_v2  ;;  %v437_v14 = vld [vmem:[%s850_s1 + $0xa8] sm:$0xff]  ;;  %v443_v25 = vld [vmem:[%s850_s1 + $0xd8] sm:$0xff] }
  0x1e   :  { %356 = vmatpush.bf16.msra.mxu0 %v574_v55  ;;  %v67_v9 = vadd.f32 %v436_v1, %v62_v3  ;;  %v440_v11 = vld [vmem:[%s850_s1 + $0xc0] sm:$0xff]  ;;  %v441_v22 = vld [vmem:[%s850_s1 + $0xc8] sm:$0xff] }
  0x1f   :  { %369 = vmatpush.bf16.msra.mxu1 %v582_v56  ;;  %v58_v12 = vadd.f32 %v433_v4, %v53_v8  ;;  %v444_v19 = vld [vmem:[%s850_s1 + $0xe0] sm:$0xff]  ;;  %v445_v28 = vld [vmem:[%s850_s1 + $0xe8] sm:$0xff] }
  0x20   :  { %382 = vmatpush.bf16.msra.mxu2 %v590_v63  ;;  %v72_v13 = vadd.f32 %v438_v7, %v67_v9 }
  0x21   :  { %395 = vmatpush.bf16.msra.mxu3 %v598_v0  ;;  %357 = vmatmul.bf16.vlgmr.msra.gmra.mxu0 %v89_v5  ;;  %v63_v16 = vadd.f32 %v435_v10, %v58_v12 }
  0x22   :  { %370 = vmatmul.bf16.vlgmr.msra.gmra.mxu1 %v90_v6  ;;  %v77_v17 = vadd.f32 %v440_v11, %v72_v13 }
  0x23   :  { %v68_v20 = vadd.f32 %v437_v14, %v63_v16 }
  0x24   :  { %v82_v21 = vadd.f32 %v442_v15, %v77_v17 }
  0x25   :  { %v73_v23 = vadd.f32 %v439_v18, %v68_v20 }
  0x26   :  { %v87_v24 = vadd.f32 %v444_v19, %v82_v21 }
  0x27   :  { %v78_v26 = vadd.f32 %v441_v22, %v73_v23 }
  0x28   :  { %v91_v27 = vpack.c.bf16 %v87_v24, %v87_v24 }
  0x29   :  { %v83_v29 = vadd.f32 %v443_v25, %v78_v26 }
  0x2a   :  { %383 = vmatmul.bf16.vlgmr.msra.gmra.mxu2 %v91_v27 }
  0x2b   :  { %v88_v30 = vadd.f32 %v445_v28, %v83_v29 }
  0x2d   :  { %v92_v31 = vpack.c.bf16 %v88_v30, %v88_v30 }
  0x2f   :  { %396 = vmatmul.bf16.vlgmr.msra.gmra.mxu3 %v92_v31 }
  0x9e   :  { %v358_v32 = vpop.f32.mrf.mxu0 }
  0x9f   :  { %v371_v33 = vpop.f32.mrf.mxu1 }
  0xa0   :  { %v372_v36 = vadd.f32 %v371_v33, %v358_v32 }
  0xa6   :  { %v360_v34 = vpop.f32.mrf.mxu0 }
  0xa7   :  { %v373_v35 = vpop.f32.mrf.mxu1 }
  0xad   :  { %v384_v37 = vpop.f32.mrf.mxu2 }
  0xae   :  { %v385_v38 = vadd.f32 %v384_v37, %v372_v36 }
  0xb2   :  { %v397_v39 = vpop.f32.mrf.mxu3 }
  0xb3   :  { %v398_v40 = vadd.f32 %v397_v39, %v385_v38 }
  0xb5   :  { %401 = vst [vmem:[#allocation2] sm:$0xff] %v398_v40  ;;  %v386_v41 = vpop.f32.mrf.mxu2 }
  0xb6   :  { %412 = dma.vmem_to_hbm [thread:$0]  %s408_s4, 128, %s410_s7, [#allocation3]  }
  0xba   :  { %v399_v42 = vpop.f32.mrf.mxu3 }
  0xbb   :  { %631 = dma.done.wait [#allocation3], 128  }
  0xbc   :  { %632 = vsyncadd [#allocation3], 4294967168 }
  0xbd   :  { %417 = vsyncpa [#allocation3], 1 }

</bundles_post_ra>
